<compile_context>
chip_gen: v7x
topology: tpu7x:2x2x1
jax: 0.10.0
libtpu: 0.0.40
codegen_flags: <defaults>
</compile_context>

<pallas_src>
import jax
import jax.numpy as jnp
from jax.experimental import pallas as pl
from jax.experimental.pallas import tpu as pltpu

# cfg values (the torch module takes them from `cfg`) — fixed deterministically here.
GAUSS_STD = 0.1
DROPOUT_PROB = 0.2

_LANE = 128
_MAX_TILE_B = 1024   # rows per grid step: (1024,128) f32 block = 0.5 MiB; with 4
                     # streams double-buffered ~4 MiB VMEM — safe on v5e/v6e/v7x.


def _augment_kernel(idx_ref, x_ref, noise_ref, keep_ref, out_ref):
    """Per-tile fused select among {identity, gauss-noise, dropout-noise}."""
    x = x_ref[...].astype(jnp.float32)        # (TB, F)
    noise = noise_ref[...]                    # (TB, F) f32, N(0, 1)
    keep = keep_ref[...]                      # (TB, F) f32, Bernoulli(1 - p)
    idx = idx_ref[...]                        # (TB, 1) int32 in [0, 3)

    is_gauss = idx == 1                       # (TB, 1) — broadcasts over lanes
    is_drop = idx == 2

    mul = jnp.where(is_drop, keep, jnp.float32(1.0))
    add = jnp.where(is_gauss, noise * jnp.float32(GAUSS_STD), jnp.float32(0.0))
    out_ref[...] = (x * mul + add).astype(out_ref.dtype)


def _pick_tile_b(b):
    if b <= _MAX_TILE_B:
        return b                 # single full-extent block along B (always legal)
    return _MAX_TILE_B           # multiple of 8; Pallas masks any ragged tail


@jax.jit
def vector_augment(x, aug_idx, noise, keep):
    """x:(B,F); aug_idx:(B,) int32 in [0,3); noise/keep:(B,F) float32."""
    B, F = x.shape
    idx2d = aug_idx.reshape(B, 1).astype(jnp.int32)

    # Keep the lane (last) dim a multiple of 128 so stores are unmasked.
    f_pad = pl.cdiv(F, _LANE) * _LANE
    if f_pad != F:
        pad = ((0, 0), (0, f_pad - F))
        x_p = jnp.pad(x, pad)
        noise_p = jnp.pad(noise, pad)
        keep_p = jnp.pad(keep, pad)
    else:
        x_p, noise_p, keep_p = x, noise, keep

    tile_b = _pick_tile_b(B)
    grid = (pl.cdiv(B, tile_b),)

    row_spec = pl.BlockSpec((tile_b, f_pad), lambda i: (i, 0))
    idx_spec = pl.BlockSpec((tile_b, 1), lambda i: (i, 0))

    out = pl.pallas_call(
        _augment_kernel,
        out_shape=jax.ShapeDtypeStruct((B, f_pad), x.dtype),
        grid_spec=pltpu.PrefetchScalarGridSpec(
            num_scalar_prefetch=0,
            grid=grid,
            in_specs=[idx_spec, row_spec, row_spec, row_spec],
            out_specs=row_spec,
        ),
        compiler_params=pltpu.CompilerParams(
            # Rows are independent -> shard grid steps across TCs on v7x megacore.
            dimension_semantics=("parallel",),
        ),
    )(idx2d, x_p, noise_p, keep_p)

    return out[:, :F] if f_pad != F else out


def vector_augmenter_forward(x, key):
    """Full module forward: draw randomness with jax.random, run the Pallas kernel."""
    B, F = x.shape
    k_idx, k_noise, k_keep = jax.random.split(key, 3)
    aug_idx = jax.random.randint(k_idx, (B,), 0, 3, dtype=jnp.int32)
    noise = jax.random.normal(k_noise, (B, F), dtype=jnp.float32)
    keep = jax.random.bernoulli(
        k_keep, p=1.0 - DROPOUT_PROB, shape=(B, F)
    ).astype(jnp.float32)
    return vector_augment(x, aug_idx, noise, keep), (aug_idx, noise, keep)


if __name__ == "__main__":
    key = jax.random.PRNGKey(0)
    k_x, k_aug = jax.random.split(key)

    # Small "vector observation" batch: 8 samples of a 128-dim vector.
    B, F = 8, 128
    x = jax.random.normal(k_x, (B, F), dtype=jnp.float32)

    out, (aug_idx, noise, keep) = vector_augmenter_forward(x, k_aug)
    out = jax.block_until_ready(out)

    assert out.shape == (B, F) and out.dtype == x.dtype

    # Pure-JAX reference using the exact same randomness.
    gauss = x + GAUSS_STD * noise          # _gauss_noise
    drop = x * keep                        # _dropout_noise (no 1/(1-p) rescale, per spec)
    all_aug = jnp.stack([x, gauss, drop], axis=0)
    ref = all_aug[aug_idx, jnp.arange(B)]
    assert bool(jnp.allclose(out, ref, atol=1e-6, rtol=1e-6))

    print("KERNEL_OK")
</pallas_src>

<mosaic_0001>
module attributes {stable_mosaic.version = 11 : i64} {
  func.func @_augment_kernel(%arg0: i32, %arg1: memref<8x1xi32, #tpu.memory_space<vmem>>, %arg2: memref<8x128xf32, #tpu.memory_space<vmem>>, %arg3: memref<8x128xf32, #tpu.memory_space<vmem>>, %arg4: memref<8x128xf32, #tpu.memory_space<vmem>>, %arg5: memref<8x128xf32, #tpu.memory_space<vmem>>) attributes {dimension_semantics = [#tpu.dimension_semantics<parallel>], iteration_bounds = array<i64: 1>, scalar_prefetch = 0 : i64, scratch_operands = 0 : i64, tpu.core_type = #tpu.core_type<tc>, window_params = [{transform_indices = @transform_0, window_bounds = array<i64: 8, 1>}, {transform_indices = @transform_1, window_bounds = array<i64: 8, 128>}, {transform_indices = @transform_2, window_bounds = array<i64: 8, 128>}, {transform_indices = @transform_3, window_bounds = array<i64: 8, 128>}, {transform_indices = @transform_4, window_bounds = array<i64: 8, 128>}]} {
    %c0 = arith.constant 0 : index
    %c0_0 = arith.constant 0 : index
    %0 = vector.load %arg2[%c0, %c0_0] : memref<8x128xf32, #tpu.memory_space<vmem>>, vector<8x128xf32>
    %c0_1 = arith.constant 0 : index
    %c0_2 = arith.constant 0 : index
    %1 = vector.load %arg3[%c0_1, %c0_2] : memref<8x128xf32, #tpu.memory_space<vmem>>, vector<8x128xf32>
    %c0_3 = arith.constant 0 : index
    %c0_4 = arith.constant 0 : index
    %2 = vector.load %arg4[%c0_3, %c0_4] : memref<8x128xf32, #tpu.memory_space<vmem>>, vector<8x128xf32>
    %c0_5 = arith.constant 0 : index
    %c0_6 = arith.constant 0 : index
    %3 = vector.load %arg1[%c0_5, %c0_6] : memref<8x1xi32, #tpu.memory_space<vmem>>, vector<8x1xi32>
    %c1_i32 = arith.constant 1 : i32
    %4 = vector.broadcast %c1_i32 : i32 to vector<8x1xi32>
    %5 = arith.cmpi eq, %3, %4 : vector<8x1xi32>
    %c2_i32 = arith.constant 2 : i32
    %6 = vector.broadcast %c2_i32 : i32 to vector<8x1xi32>
    %7 = arith.cmpi eq, %3, %6 : vector<8x1xi32>
    %cst = arith.constant 1.000000e+00 : f32
    %8 = vector.shape_cast %7 : vector<8x1xi1> to vector<8x1xi1>
    %9 = vector.broadcast %8 : vector<8x1xi1> to vector<8x128xi1>
    %10 = vector.broadcast %cst : f32 to vector<8x128xf32>
    %11 = arith.select %9, %2, %10 : vector<8x128xi1>, vector<8x128xf32>
    %cst_7 = arith.constant 1.000000e-01 : f32
    %12 = vector.broadcast %cst_7 : f32 to vector<8x128xf32>
    %13 = arith.mulf %1, %12 : vector<8x128xf32>
    %cst_8 = arith.constant 0.000000e+00 : f32
    %14 = vector.shape_cast %5 : vector<8x1xi1> to vector<8x1xi1>
    %15 = vector.broadcast %14 : vector<8x1xi1> to vector<8x128xi1>
    %16 = vector.broadcast %cst_8 : f32 to vector<8x128xf32>
    %17 = arith.select %15, %13, %16 : vector<8x128xi1>, vector<8x128xf32>
    %18 = arith.mulf %0, %11 : vector<8x128xf32>
    %19 = arith.addf %18, %17 : vector<8x128xf32>
    %c0_9 = arith.constant 0 : index
    %c0_10 = arith.constant 0 : index
    %20 = vector.load %arg5[%c0_9, %c0_10] : memref<8x128xf32, #tpu.memory_space<vmem>>, vector<8x128xf32>
    tpu.vector_store %arg5[%c0_9, %c0_10], %19 {strides = array<i32>} : memref<8x128xf32, #tpu.memory_space<vmem>>, vector<8x128xf32>,
    return
  }
  func.func @transform_0(%arg0: i32) -> (i32, i32) {
    %c0_i32 = arith.constant 0 : i32
    %c0_i32_0 = arith.constant 0 : i32
    return %arg0, %c0_i32 : i32, i32
  }
  func.func @transform_1(%arg0: i32) -> (i32, i32) {
    %c0_i32 = arith.constant 0 : i32
    %c0_i32_0 = arith.constant 0 : i32
    return %arg0, %c0_i32 : i32, i32
  }
  func.func @transform_2(%arg0: i32) -> (i32, i32) {
    %c0_i32 = arith.constant 0 : i32
    %c0_i32_0 = arith.constant 0 : i32
    return %arg0, %c0_i32 : i32, i32
  }
  func.func @transform_3(%arg0: i32) -> (i32, i32) {
    %c0_i32 = arith.constant 0 : i32
    %c0_i32_0 = arith.constant 0 : i32
    return %arg0, %c0_i32 : i32, i32
  }
  func.func @transform_4(%arg0: i32) -> (i32, i32) {
    %c0_i32 = arith.constant 0 : i32
    %c0_i32_0 = arith.constant 0 : i32
    return %arg0, %c0_i32 : i32, i32
  }
}

</mosaic_0001>

<bundles_post_ra>
// kernel: vector_augment.1
= control target key start
LH: loop header
LB: loop body
LE: loop exit
PB: predicated region body
PF: predicated region fallthrough
CT: control target
= control target key end

     0   :  { %s132_s0 = inlined_call_operand.vmem [shape: s32[8,1], index: 0, kind: input, shape index: {}]   ;;  %s133_s1 = inlined_call_operand.vmem [shape: f32[8,128], index: 1, kind: input, shape index: {}]   ;;  %s134_s2 = inlined_call_operand.vmem [shape: f32[8,128], index: 2, kind: input, shape index: {}]   ;;  %s135_s3 = inlined_call_operand.vmem [shape: f32[8,128], index: 3, kind: input, shape index: {}]   ;;  %s136_s4 = inlined_call_operand.hbm [shape: f32[8,128], index: 4, kind: output, shape index: {}]  }
   0x1   :  { %v21_v0 = vld [vmem:[%s132_s0] sm:$0xff] }
   0x2   :  { %9 = vsyncpa [#allocation3], 0  ;;  %v81_v1 = vmov 0   ;;  %vm23_vm0 = vcmp.eq.s32.totalorder %v21_v0, 2  ;;  %vm22_vm1 = vcmp.eq.s32.totalorder %v21_v0, 1  ;;  %v20_v4 = vld [vmem:[%s135_s3] sm:$0xff] }
   0x3   :  { %56 = vset.pattern.permute.xlu0 %v81_v1  ;;  %v24_v2 = vsel %vm23_vm0, 1, %v81_v1  ;;  %v31_v3 = vsel %vm22_vm1, 1, %v81_v1  ;;  %v19_v5 = vld [vmem:[%s134_s2] sm:$0xff]  ;;  %s82_s22 = smov [#allocation2]  }
   0x4   :  { %26 = vperm.xlu0 %56, %v24_v2   ;;  %v18_v7 = vld [vmem:[%s133_s1] sm:$0xff]  ;;  %v30_v9 = vmul.f32 0.1, %v19_v5  ;;  %s46_s23 = sshll.u32 %s82_s22, 4  ;;  %s47_s23 = int_to_ptr.vmem [resolvable:$true] %s46_s23 }
   0x5   :  { %s57_s3 = scalar_lea.vmem %s47_s23, 128  ;;  %p62_p1 = scmp.lt.s32.totalorder %s47_s23, %s47_s23 }
   0x6   :  { %p58_p0 = scmp.ne.s32.totalorder %s47_s23, %s57_s3  ;;  %p63_p2 = scmp.lt.s32.totalorder %s57_s3, %s57_s3 }
   0x8   :  { %33 = vperm.xlu0 %56, %v31_v3   ;;  %p64_p3 = por %p63_p2, %p62_p1 }
   0xa   :  { %p65_p4 = pnand %p64_p3, %p58_p0 }
  0x83   :  { %v27_v6 = vpop.permute.xlu0 %26 }
  0x84   :  { %vm28_vm2 = vcmp.eq.s32.totalorder %v27_v6, 1 }
  0x85   :  { %v29_v8 = vsel %vm28_vm2, %v20_v4, 1.0 }
  0x86   :  { %v37_v11 = vmul.f32 %v29_v8, %v18_v7 }
  0x87   :  { %v34_v10 = vpop.permute.xlu0 %33 }
  0x88   :  { %vm35_vm3 = vcmp.eq.s32.totalorder %v34_v10, 1 }
  0x89   :  { %v36_v12 = vsel %vm35_vm3, %v30_v9, 0.0 }
  0x8a   :  { %v38_v13 = vadd.f32 %v37_v11, %v36_v12 }
  0x8c   :  { %39 = vst [vmem:[#allocation2] sm:$0xff] %v38_v13 }
  0x8d   :  { %68 = shalt.err (!%p65_p4)
}
  0x8e   :  { %s69_s24 = scalar_lea.hbm %s136_s4, 128 }
  0x8f   :  { %p70_p5 = scmp.ne.s32.totalorder %s136_s4, %s69_s24  ;;  %p73_p6 = scmp.lt.u32.totalorder %s69_s24, %s136_s4 }
  0x91   :  { %p75_p7 = pnand %p73_p6, %p70_p5 }
  0x93   :  { %78 = shalt.err (!%p75_p7)
}
  0x94   :  { %49 = dma.vmem_to_hbm [thread:$0]  %s47_s23, 128, %s136_s4, [#allocation3]  }
  0x95   :  { %79 = dma.done.wait [#allocation3], 128  }
  0x96   :  { %80 = vsyncadd [#allocation3], 4294967168 }
  0x97   :  { %53 = vsyncpa [#allocation3], 1 }

</bundles_post_ra>
